<compile_context>
chip_gen: v6e
topology: v6e:2x2x1
jax: 0.10.0
libtpu: 0.0.40
codegen_flags: <defaults>
</compile_context>

<pallas_src>
import functools

import jax
import jax.numpy as jnp
from jax.experimental import pallas as pl
from jax.experimental.pallas import tpu as pltpu


def _mha_kernel(x_ref, wqkv_ref, bqkv_ref, woh_ref, bo_ref, o_ref,
                *, approx_softmax):
    """One batch element per grid step, channels-first in / channels-first out.

    x_ref    : (1, E, S)      input block (same layout as the module input)
    wqkv_ref : (3H, E, Dh)    per-(q|k|v, head) projection weights, (in, out)
    bqkv_ref : (3H, 1, Dh)    matching biases (fp32)
    woh_ref  : (H, E, Dh)     woh_ref[h, o, d] = wo[o, h*Dh + d]
    bo_ref   : (E, 1)         output-projection bias (fp32, channels-first)
    o_ref    : (1, E, S)
    """
    _, e, s = x_ref.shape
    gh, _, dh = wqkv_ref.shape          # gh = 3 * H
    h_num = gh // 3
    cd = wqkv_ref.dtype                 # MXU operand dtype (bf16 default / fp32)

    # --- Fused input permute: one in-kernel 2D XLU transpose replaces the ---
    # --- XLA (B,E,S)->(B,S,E) permute (saves an HBM round trip).          ---
    x_cl = jnp.transpose(x_ref[0])                          # (S, E) fp32

    # --- Head-batched fused QKV projection -------------------------------
    # Tokens are broadcast across the (q|k|v, head) batch axis so each head's
    # projection is one batched MXU matmul and q/k/v land directly in
    # (H, S, Dh) layout: no lane slicing, no axis shuffles, fp32 accumulation.
    x_b = jnp.broadcast_to(x_cl, (gh, s, e)).astype(cd)     # (3H, S, E)
    qkv = jnp.einsum('gse,ged->gsd', x_b, wqkv_ref[...],
                     preferred_element_type=jnp.float32)    # (3H, S, Dh) fp32
    qkv = qkv + bqkv_ref[...]                               # bias broadcast over S

    q = qkv[0:h_num].astype(cd)                             # (H, S, Dh)
    k = qkv[h_num:2 * h_num].astype(cd)
    v = qkv[2 * h_num:3 * h_num].astype(cd)

    # --- Batched-head attention (softmax math kept in fp32 on all gens) ---
    # NOTE: no 1/sqrt(Dh) scaling -- the PyTorch reference omits it.
    scores = jnp.einsum('hqd,hkd->hqk', q, k,
                        preferred_element_type=jnp.float32)  # (H, S, S) fp32
    m = jnp.max(scores, axis=-1, keepdims=True)
    p = jnp.exp(scores - m)
    denom = jnp.sum(p, axis=-1, keepdims=True)
    if approx_softmax:
        w = p * pl.reciprocal(denom, approx=True)            # EUP vrcp (bf16 path)
    else:
        w = p / denom                                        # exact (fp32 parity)
    heads = jnp.einsum('hqk,hkd->hqd', w.astype(cd), v,
                       preferred_element_type=jnp.float32)   # (H, S, Dh) fp32

    # --- Output projection, folded per head and batched over heads --------
    # Produced directly channels-first so the output permute is fused too.
    y_h = jnp.einsum('hed,hsd->hes', woh_ref[...], heads.astype(cd),
                     preferred_element_type=jnp.float32)     # (H, E, S) fp32
    y_cf = jnp.sum(y_h, axis=0) + bo_ref[...]                # (E, S) fp32
    o_ref[...] = y_cf.reshape(1, e, s).astype(o_ref.dtype)


@functools.partial(jax.jit, static_argnames=("compute_dtype",))
def multi_head_attention(hidden_state, wq, bq, wk, bk, wv, bv, wo, bo,
                         *, compute_dtype=jnp.bfloat16):
    """hidden_state: (B, E, S) -- same convention as the PyTorch module.

    wq/wk/wv : (H, Dh, E) per-head nn.Linear weights (out, in layout)
    bq/bk/bv : (H, Dh)    per-head biases
    wo       : (E, E), bo: (E,)  output projection
    """
    B, E, S = hidden_state.shape
    H, Dh, _ = wq.shape

    # Pack weights ONCE in the wrapper (tiny XLA ops on the weights only):
    #   wqkv_t[g] = concat([wq, wk, wv])[g].T  -> (in, out) per (q|k|v, head)
    #   woh[h, o, d] = wo[o, h*Dh + d]         -> per-head slice of wo
    wqkv_t = jnp.swapaxes(jnp.concatenate([wq, wk, wv], axis=0), 1, 2)
    wqkv_t = wqkv_t.astype(compute_dtype)                          # (3H, E, Dh)
    bqkv = jnp.concatenate([bq, bk, bv], axis=0).astype(jnp.float32)
    bqkv = bqkv.reshape(3 * H, 1, Dh)                              # (3H, 1, Dh)
    woh = jnp.swapaxes(wo.reshape(E, H, Dh), 0, 1).astype(compute_dtype)  # (H, E, Dh)
    bo_cf = bo.astype(jnp.float32).reshape(E, 1)                   # (E, 1)

    def const(shape):
        return pl.BlockSpec(shape, lambda b: (0,) * len(shape))

    kernel = functools.partial(
        _mha_kernel, approx_softmax=(compute_dtype == jnp.bfloat16))

    out = pl.pallas_call(
        kernel,
        out_shape=jax.ShapeDtypeStruct((B, E, S), hidden_state.dtype),
        grid_spec=pltpu.PrefetchScalarGridSpec(
            num_scalar_prefetch=0,
            grid=(B,),                               # >=2 parallel steps for B>=2
            in_specs=[
                pl.BlockSpec((1, E, S), lambda b: (b, 0, 0)),   # activation
                const((3 * H, E, Dh)),                          # fused qkv weights
                const((3 * H, 1, Dh)),                          # fused qkv biases
                const((H, E, Dh)),                              # out-proj head slices
                const((E, 1)),                                  # out-proj bias
            ],
            out_specs=pl.BlockSpec((1, E, S), lambda b: (b, 0, 0)),
        ),
        compiler_params=pltpu.CompilerParams(
            dimension_semantics=("parallel",),
            # Explicit VMEM budget (re-derived for v7x's 64 MiB physical VMEM):
            # blocks here are tiny, so 32 MiB leaves enormous headroom on every
            # generation while staying well under the v7x cap.
            vmem_limit_bytes=32 * 1024 * 1024,
        ),
    )(hidden_state, wqkv_t, bqkv, woh, bo_cf)

    return out                                        # already (B, E, S)


def _reference(hidden_state, wq, bq, wk, bk, wv, bv, wo, bo):
    """Pure-JAX reference mirroring the PyTorch forward exactly (fp32)."""
    x = jnp.transpose(hidden_state, (0, 2, 1))        # (B, S, E)
    H = wq.shape[0]
    outs = []
    for h in range(H):
        q = x @ wq[h].T + bq[h]
        k = x @ wk[h].T + bk[h]
        v = x @ wv[h].T + bv[h]
        scores = jnp.einsum("bqd,bkd->bqk", q, k)     # no 1/sqrt(Dh), as in torch code
        w = jax.nn.softmax(scores, axis=-1)
        outs.append(jnp.einsum("bqk,bkd->bqd", w, v))
    cat = jnp.concatenate(outs, axis=-1)
    y = cat @ wo.T + bo
    return jnp.transpose(y, (0, 2, 1))                # (B, E, S)


if __name__ == "__main__":
    # Small config: hidden_size=32, num_attention_heads=4 -> head_dim=8
    B, E, S = 2, 32, 8
    H = 4
    Dh = E // H

    key = jax.random.PRNGKey(0)
    ks = jax.random.split(key, 10)

    hidden_state = jax.random.normal(ks[0], (B, E, S), dtype=jnp.float32)

    scale = 1.0 / jnp.sqrt(jnp.float32(E))
    wq = jax.random.uniform(ks[1], (H, Dh, E), minval=-scale, maxval=scale)
    bq = jax.random.uniform(ks[2], (H, Dh), minval=-scale, maxval=scale)
    wk = jax.random.uniform(ks[3], (H, Dh, E), minval=-scale, maxval=scale)
    bk = jax.random.uniform(ks[4], (H, Dh), minval=-scale, maxval=scale)
    wv = jax.random.uniform(ks[5], (H, Dh, E), minval=-scale, maxval=scale)
    bv = jax.random.uniform(ks[6], (H, Dh), minval=-scale, maxval=scale)
    wo = jax.random.uniform(ks[7], (E, E), minval=-scale, maxval=scale)
    bo = jax.random.uniform(ks[8], (E,), minval=-scale, maxval=scale)

    ref = _reference(hidden_state, wq, bq, wk, bk, wv, bv, wo, bo)

    # Default fast path: bf16 MXU operands, fp32 accumulation, approx softmax
    # reciprocal on the EUP.
    out = multi_head_attention(hidden_state, wq, bq, wk, bk, wv, bv, wo, bo)
    out = jax.block_until_ready(out)
    assert out.shape == (B, E, S), out.shape
    assert float(jnp.max(jnp.abs(out - ref))) < 1e-1, "bf16 path diverged"

    # fp32 parity mode: must match the fp32 reference tightly.
    out_f32 = multi_head_attention(hidden_state, wq, bq, wk, bk, wv, bv, wo, bo,
                                   compute_dtype=jnp.float32)
    out_f32 = jax.block_until_ready(out_f32)
    assert jnp.allclose(out_f32, ref, atol=1e-5, rtol=1e-5), "fp32 mismatch vs reference"

    print("KERNEL_OK")
</pallas_src>

<mosaic_0001>
module attributes {stable_mosaic.version = 11 : i64} {
  func.func @_mha_kernel(%arg0: i32, %arg1: memref<1x32x8xf32, #tpu.memory_space<vmem>>, %arg2: memref<12x32x8xbf16, #tpu.memory_space<vmem>>, %arg3: memref<12x1x8xf32, #tpu.memory_space<vmem>>, %arg4: memref<4x32x8xbf16, #tpu.memory_space<vmem>>, %arg5: memref<32x1xf32, #tpu.memory_space<vmem>>, %arg6: memref<1x32x8xf32, #tpu.memory_space<vmem>>) attributes {dimension_semantics = [#tpu.dimension_semantics<parallel>], iteration_bounds = array<i64: 2>, scalar_prefetch = 0 : i64, scratch_operands = 0 : i64, tpu.core_type = #tpu.core_type<tc>, window_params = [{transform_indices = @transform_0, window_bounds = array<i64: 1, 32, 8>}, {pipeline_mode = #tpu.pipeline_mode<synchronous>, transform_indices = @transform_1, window_bounds = array<i64: 12, 32, 8>}, {pipeline_mode = #tpu.pipeline_mode<synchronous>, transform_indices = @transform_2, window_bounds = array<i64: 12, 1, 8>}, {pipeline_mode = #tpu.pipeline_mode<synchronous>, transform_indices = @transform_3, window_bounds = array<i64: 4, 32, 8>}, {pipeline_mode = #tpu.pipeline_mode<synchronous>, transform_indices = @transform_4, window_bounds = array<i64: 32, 1>}, {transform_indices = @transform_5, window_bounds = array<i64: 1, 32, 8>}]} {
    %c0 = arith.constant 0 : index
    %c0_0 = arith.constant 0 : index
    %c0_1 = arith.constant 0 : index
    %0 = vector.load %arg1[%c0, %c0_0, %c0_1] : memref<1x32x8xf32, #tpu.memory_space<vmem>>, vector<1x32x8xf32>
    %1 = vector.shape_cast %0 : vector<1x32x8xf32> to vector<32x8xf32>
    %2 = tpu.transpose %1, [1, 0] : vector<32x8xf32> -> vector<8x32xf32>
    %3 = vector.shape_cast %2 : vector<8x32xf32> to vector<1x8x32xf32>
    %4 = vector.broadcast %3 : vector<1x8x32xf32> to vector<12x8x32xf32>
    %5 = arith.truncf %4 : vector<12x8x32xf32> to vector<12x8x32xbf16>
    %c0_2 = arith.constant 0 : index
    %c0_3 = arith.constant 0 : index
    %c0_4 = arith.constant 0 : index
    %6 = vector.load %arg2[%c0_2, %c0_3, %c0_4] : memref<12x32x8xbf16, #tpu.memory_space<vmem>>, vector<12x32x8xbf16>
    "tpu.trace_start"() <{level = 10 : i32, message = "gse,ged->gsd"}> : () -> ()
    %cst = arith.constant dense<0.000000e+00> : vector<12x8x8xf32>
    %7 = tpu.matmul %5, %6, %cst {dimension_numbers = #tpu.dot_dimension_numbers<[2], [1], [1], [2], [0, 0, 0, 1, 1, 2], [0], [0]>} : vector<12x8x32xbf16>, vector<12x32x8xbf16>, vector<12x8x8xf32> -> vector<12x8x8xf32>
    "tpu.trace_stop"() : () -> ()
    %c0_5 = arith.constant 0 : index
    %c0_6 = arith.constant 0 : index
    %c0_7 = arith.constant 0 : index
    %8 = vector.load %arg3[%c0_5, %c0_6, %c0_7] : memref<12x1x8xf32, #tpu.memory_space<vmem>>, vector<12x1x8xf32>
    %9 = vector.broadcast %8 : vector<12x1x8xf32> to vector<12x8x8xf32>
    %10 = arith.addf %7, %9 : vector<12x8x8xf32>
    %11 = vector.extract_strided_slice %10 {offsets = [0, 0, 0], sizes = [4, 8, 8], strides = [1, 1, 1]} : vector<12x8x8xf32> to vector<4x8x8xf32>
    %12 = arith.truncf %11 : vector<4x8x8xf32> to vector<4x8x8xbf16>
    %13 = vector.extract_strided_slice %10 {offsets = [4, 0, 0], sizes = [4, 8, 8], strides = [1, 1, 1]} : vector<12x8x8xf32> to vector<4x8x8xf32>
    %14 = arith.truncf %13 : vector<4x8x8xf32> to vector<4x8x8xbf16>
    %15 = vector.extract_strided_slice %10 {offsets = [8, 0, 0], sizes = [4, 8, 8], strides = [1, 1, 1]} : vector<12x8x8xf32> to vector<4x8x8xf32>
    %16 = arith.truncf %15 : vector<4x8x8xf32> to vector<4x8x8xbf16>
    "tpu.trace_start"() <{level = 10 : i32, message = "hqd,hkd->hqk"}> : () -> ()
    %cst_8 = arith.constant dense<0.000000e+00> : vector<4x8x8xf32>
    %17 = tpu.matmul %12, %14, %cst_8 {dimension_numbers = #tpu.dot_dimension_numbers<[2], [2], [1], [1], [0, 0, 0, 1, 1, 1], [0], [0]>} : vector<4x8x8xbf16>, vector<4x8x8xbf16>, vector<4x8x8xf32> -> vector<4x8x8xf32>
    "tpu.trace_stop"() : () -> ()
    %cst_9 = arith.constant dense<0xFF800000> : vector<4x8xf32>
    %18 = vector.multi_reduction <maximumf>, %17, %cst_9 [2] : vector<4x8x8xf32> to vector<4x8xf32>
    %19 = vector.shape_cast %18 : vector<4x8xf32> to vector<4x8x1xf32>
    %20 = vector.broadcast %19 : vector<4x8x1xf32> to vector<4x8x8xf32>
    %21 = arith.subf %17, %20 : vector<4x8x8xf32>
    %22 = math.exp %21 : vector<4x8x8xf32>
    %cst_10 = arith.constant dense<0.000000e+00> : vector<4x8xf32>
    %23 = vector.multi_reduction <add>, %22, %cst_10 [2] : vector<4x8x8xf32> to vector<4x8xf32>
    %24 = vector.shape_cast %23 : vector<4x8xf32> to vector<4x8x1xf32>
    %25 = tpu.reciprocal %24 {approx = true} : vector<4x8x1xf32> -> vector<4x8x1xf32>
    %26 = vector.broadcast %25 : vector<4x8x1xf32> to vector<4x8x8xf32>
    %27 = arith.mulf %22, %26 : vector<4x8x8xf32>
    %28 = arith.truncf %27 : vector<4x8x8xf32> to vector<4x8x8xbf16>
    "tpu.trace_start"() <{level = 10 : i32, message = "hqk,hkd->hqd"}> : () -> ()
    %cst_11 = arith.constant dense<0.000000e+00> : vector<4x8x8xf32>
    %29 = tpu.matmul %28, %16, %cst_11 {dimension_numbers = #tpu.dot_dimension_numbers<[2], [1], [1], [2], [0, 0, 0, 1, 1, 2], [0], [0]>} : vector<4x8x8xbf16>, vector<4x8x8xbf16>, vector<4x8x8xf32> -> vector<4x8x8xf32>
    "tpu.trace_stop"() : () -> ()
    %c0_12 = arith.constant 0 : index
    %c0_13 = arith.constant 0 : index
    %c0_14 = arith.constant 0 : index
    %30 = vector.load %arg4[%c0_12, %c0_13, %c0_14] : memref<4x32x8xbf16, #tpu.memory_space<vmem>>, vector<4x32x8xbf16>
    %31 = arith.truncf %29 : vector<4x8x8xf32> to vector<4x8x8xbf16>
    "tpu.trace_start"() <{level = 10 : i32, message = "hed,hsd->hes"}> : () -> ()
    %cst_15 = arith.constant dense<0.000000e+00> : vector<4x32x8xf32>
    %32 = tpu.matmul %30, %31, %cst_15 {dimension_numbers = #tpu.dot_dimension_numbers<[2], [2], [1], [1], [0, 0, 0, 1, 1, 1], [0], [0]>} : vector<4x32x8xbf16>, vector<4x8x8xbf16>, vector<4x32x8xf32> -> vector<4x32x8xf32>
    "tpu.trace_stop"() : () -> ()
    %cst_16 = arith.constant dense<0.000000e+00> : vector<32x8xf32>
    %33 = vector.multi_reduction <add>, %32, %cst_16 [0] : vector<4x32x8xf32> to vector<32x8xf32>
    %c0_17 = arith.constant 0 : index
    %c0_18 = arith.constant 0 : index
    %34 = vector.load %arg5[%c0_17, %c0_18] : memref<32x1xf32, #tpu.memory_space<vmem>>, vector<32x1xf32>
    %35 = vector.broadcast %34 : vector<32x1xf32> to vector<32x8xf32>
    %36 = arith.addf %33, %35 : vector<32x8xf32>
    %37 = vector.shape_cast %36 : vector<32x8xf32> to vector<1x32x8xf32>
    %c0_19 = arith.constant 0 : index
    %c0_20 = arith.constant 0 : index
    %c0_21 = arith.constant 0 : index
    %38 = vector.load %arg6[%c0_19, %c0_20, %c0_21] : memref<1x32x8xf32, #tpu.memory_space<vmem>>, vector<1x32x8xf32>
    tpu.vector_store %arg6[%c0_19, %c0_20, %c0_21], %37 {strides = array<i32>} : memref<1x32x8xf32, #tpu.memory_space<vmem>>, vector<1x32x8xf32>,
    return
  }
  func.func @transform_0(%arg0: i32) -> (i32, i32, i32) {
    %c0_i32 = arith.constant 0 : i32
    %c0_i32_0 = arith.constant 0 : i32
    %c0_i32_1 = arith.constant 0 : i32
    return %arg0, %c0_i32, %c0_i32_0 : i32, i32, i32
  }
  func.func @transform_1(%arg0: i32) -> (i32, i32, i32) {
    %c0_i32 = arith.constant 0 : i32
    %c0_i32_0 = arith.constant 0 : i32
    %c0_i32_1 = arith.constant 0 : i32
    %c0_i32_2 = arith.constant 0 : i32
    return %c0_i32, %c0_i32_0, %c0_i32_1 : i32, i32, i32
  }
  func.func @transform_2(%arg0: i32) -> (i32, i32, i32) {
    %c0_i32 = arith.constant 0 : i32
    %c0_i32_0 = arith.constant 0 : i32
    %c0_i32_1 = arith.constant 0 : i32
    %c0_i32_2 = arith.constant 0 : i32
    return %c0_i32, %c0_i32_0, %c0_i32_1 : i32, i32, i32
  }
  func.func @transform_3(%arg0: i32) -> (i32, i32, i32) {
    %c0_i32 = arith.constant 0 : i32
    %c0_i32_0 = arith.constant 0 : i32
    %c0_i32_1 = arith.constant 0 : i32
    %c0_i32_2 = arith.constant 0 : i32
    return %c0_i32, %c0_i32_0, %c0_i32_1 : i32, i32, i32
  }
  func.func @transform_4(%arg0: i32) -> (i32, i32) {
    %c0_i32 = arith.constant 0 : i32
    %c0_i32_0 = arith.constant 0 : i32
    %c0_i32_1 = arith.constant 0 : i32
    return %c0_i32, %c0_i32_0 : i32, i32
  }
  func.func @transform_5(%arg0: i32) -> (i32, i32, i32) {
    %c0_i32 = arith.constant 0 : i32
    %c0_i32_0 = arith.constant 0 : i32
    %c0_i32_1 = arith.constant 0 : i32
    return %arg0, %c0_i32, %c0_i32_0 : i32, i32, i32
  }
}

</mosaic_0001>

<bundles_post_ra>
// kernel: multi_head_attention.1
= control target key start
LH: loop header
LB: loop body
LE: loop exit
PB: predicated region body
PF: predicated region fallthrough
CT: control target
= control target key end

     0   :  { %s2283_s18 = smov 0   ;;  %s2615_s0 = inlined_call_operand.vmem [shape: f32[2,32,8], index: 0, kind: input, shape index: {}]   ;;  %s2616_s1 = inlined_call_operand.vmem [shape: bf16[12,32,8], index: 1, kind: input, shape index: {}]   ;;  %s2617_s2 = inlined_call_operand.vmem [shape: f32[12,1,8], index: 2, kind: input, shape index: {}]   ;;  %s2618_s3 = inlined_call_operand.vmem [shape: bf16[4,32,8], index: 3, kind: input, shape index: {}]   ;;  %s2619_s4 = inlined_call_operand.vmem [shape: f32[32,1], index: 4, kind: input, shape index: {}]   ;;  %s2620_s5 = inlined_call_operand.vmem [shape: f32[2,32,8], index: 5, kind: output, shape index: {}]  }
   0x1 LB: > { %s1860_s19 = sadd.s32 4294967295, %s2248_s18   ;;  %p1864_p0 = scmp.ge.s32.totalorder %s2248_s18, 1  ;;  %s2248_s18 = sphi %s2283_s18, %s15_s18  }
   0x2   : > { %p187_p1 = scmp.lt.s32.totalorder %s2248_s18, 3 }
   0x4   : > { %p188_p2 = pnand %p1864_p0, %p187_p1 }
   0x5   : > { %p215_p3 = scmp.lt.s32.totalorder (!%p188_p2), %s1860_s19, 1 }
   0x6   : > { %191 = sbr.rel (%p188_p2) target bundleno = 1291 (0x50b), region = 40 }
   0xb   : > { %v2250_v0 = vmov 0.0   ;;  %v2194_v1 = vld [vmem:[%s2616_s1 + $0x8] sm:$0xff]   ;;  %s2622_s19 = smov (!%p215_p3, %s1860_s19), 1  ;;  %v2195_v2 = vld [vmem:[%s2616_s1 + $0x18] sm:$0xff]   ;;  %v2196_v3 = vld [vmem:[%s2616_s1] sm:$0xff]   ;;  %vm2251_vm0 = vmmov 0  }
   0xc   : > { %2009 = vmatprep.subr.bf16.mxu0 %v2250_v0  ;;  %2017 = vmatprep.subr.bf16.mxu1 %v2250_v0  ;;  %s1943_s26 = sshll.u32 %s2622_s19, 5  ;;  %v2197_v4 = vld [vmem:[%s2616_s1 + $0x10] sm:$0xff]   ;;  %vm407_vm1 = vcmask 261120   ;;  %v2198_v10 = vld [vmem:[%s2616_s1 + $0x28] sm:$0xff]   ;;  %v2199_v11 = vld [vmem:[%s2616_s1 + $0x38] sm:$0xff]   ;;  %vm1035_vm2 = vcmask 64512  }
   0xd   : > { %2010 = vmatpush3.bf16.msra.mxu0 %v2194_v1  ;;  %2018 = vmatpush3.bf16.msra.mxu1 %v2195_v2  ;;  %s219_s6 = scalar_lea.vmem %s2615_s0, %s1943_s26  ;;  %v2200_v13 = vld [vmem:[%s2616_s1 + $0x20] sm:$0xff]   ;;  %v2201_v14 = vld [vmem:[%s2616_s1 + $0x30] sm:$0xff]   ;;  %v2202_v15 = vld [vmem:[%s2616_s1 + $0x48] sm:$0xff]   ;;  %vm1271_vm3 = vcmask 1043456   ;;  %s224_s9 = scalar_lea.vmem %s2620_s5, %s1943_s26 }
   0xe   : > { %2011 = vmatprep.subr.bf16.mxu0 %v2250_v0  ;;  %2019 = vmatprep.subr.bf16.mxu1 %v2250_v0  ;;  %v226_v5 = vld [vmem:[%s219_s6] sm:$0xff]  ;;  %v227_v6 = vld [vmem:[%s219_s6 + $0x8] sm:$0xff]  ;;  %v228_v7 = vld [vmem:[%s219_s6 + $0x10] sm:$0xff] }
   0xf   : > { %2013 = vmatprep.mubr.msk.bf16.mxu0 %vm2251_vm0, %v2250_v0  ;;  %2021 = vmatprep.mubr.msk.bf16.mxu1 %vm2251_vm0, %v2250_v0  ;;  %v229_v8 = vld [vmem:[%s219_s6 + $0x18] sm:$0xff]  ;;  %v2204_v17 = vld [vmem:[%s2616_s1 + $0x40] sm:$0xff]   ;;  %v2205_v18 = vld [vmem:[%s2616_s1 + $0x50] sm:$0xff]  }
  0x10   : > { %230 = vxpose.xlu0.b32.start [1/4] (short) (narrow) %v226_v5, 8  ;;  %v2203_v16 = vld [vmem:[%s2616_s1 + $0x58] sm:$0xff]   ;;  %v2206_v19 = vld [vmem:[%s2616_s1 + $0x68] sm:$0xff]   ;;  %v2208_v21 = vld [vmem:[%s2616_s1 + $0x60] sm:$0xff]  }
  0x11   : > { %2012 = vmatpush3.bf16.msra.mxu0 %v2196_v3  ;;  %2020 = vmatpush3.bf16.msra.mxu1 %v2197_v4  ;;  %v2207_v20 = vld [vmem:[%s2616_s1 + $0x78] sm:$0xff]   ;;  %v2209_v22 = vld [vmem:[%s2616_s1 + $0x70] sm:$0xff]   ;;  %v2210_v23 = vld [vmem:[%s2616_s1 + $0x88] sm:$0xff]  }
  0x12   : > { %2025 = vmatprep.subr.bf16.mxu0 %v2250_v0  ;;  %2033 = vmatprep.subr.bf16.mxu1 %v2250_v0  ;;  %v2211_v24 = vld [vmem:[%s2616_s1 + $0x98] sm:$0xff]   ;;  %v2212_v25 = vld [vmem:[%s2616_s1 + $0x80] sm:$0xff]   ;;  %v2213_v26 = vld [vmem:[%s2616_s1 + $0x90] sm:$0xff]  }
  0x13   : > { %v2214_v27 = vld [vmem:[%s2616_s1 + $0xa8] sm:$0xff]   ;;  %v2215_v28 = vld [vmem:[%s2616_s1 + $0xb8] sm:$0xff]   ;;  %v2216_v29 = vld [vmem:[%s2616_s1 + $0xa0] sm:$0xff]  }
  0x14   : > { %231 = vxpose.xlu0.b32.cont [2/4] (short) (narrow) %v227_v6, 8  ;;  %v2217_v30 = vld [vmem:[%s2616_s1 + $0xb0] sm:$0xff]   ;;  %v1873_v47 = vld [vmem:[%s2617_s2 + $0x4] ss:$0 sm:$0xff]  ;;  %v1874_v48 = vld [vmem:[%s2617_s2 + $0x5] ss:$0 sm:$0xff] }
  0x15   : > { %v1869_v57 = vld [vmem:[%s2617_s2] ss:$0 sm:$0xff]  ;;  %v1870_v58 = vld [vmem:[%s2617_s2 + $0x1] ss:$0 sm:$0xff]  ;;  %v1875_v2 = vld [vmem:[%s2617_s2 + $0x6] ss:$0 sm:$0xff] }
  0x16   : > { %v1876_v3 = vld [vmem:[%s2617_s2 + $0x7] ss:$0 sm:$0xff] }
  0x18   : > { %232 = vxpose.xlu0.b32.cont [3/4] (short) (narrow) %v228_v7, 8 }
  0x1c   : > { %233 = vxpose.xlu0.b32.end [4/4] (short) (narrow) %v229_v8, 8 }
  0x8c   : > { %v246_v9 = vpop.trf.xlu0 }
  0x8d   : > { %v2327_v12 = vpack.c.bf16 %v246_v9, %v246_v9 }
  0x8f   : > { %2014 = vmatmul.mubr.msk.bf16.vlgmr.msra.gmra.mxu0 %vm407_vm1, %v2327_v12  ;;  %2022 = vmatmul.mubr.msk.bf16.vlgmr.msra.gmra.mxu1 %vm407_vm1, %v2327_v12 }
  0x90   : > { %2026 = vmatpush3.bf16.msra.mxu0 %v2198_v10  ;;  %2034 = vmatpush3.bf16.msra.mxu1 %v2199_v11 }
  0x91   : > { %2027 = vmatprep.subr.bf16.mxu0 %v2250_v0  ;;  %2035 = vmatprep.subr.bf16.mxu1 %v2250_v0 }
  0x92   : > { %2029 = vmatprep.mubr.msk.bf16.mxu0 %vm2251_vm0, %v2250_v0  ;;  %2037 = vmatprep.mubr.msk.bf16.mxu1 %vm2251_vm0, %v2250_v0 }
  0x94   : > { %2028 = vmatpush3.bf16.msra.mxu0 %v2200_v13  ;;  %2036 = vmatpush3.bf16.msra.mxu1 %v2201_v14 }
  0x95   : > { %2041 = vmatprep.subr.bf16.mxu0 %v2250_v0  ;;  %2049 = vmatprep.subr.bf16.mxu1 %v2250_v0 }
  0x97   : > { %2030 = vmatmul.mubr.msk.bf16.vlgmr.msra.gmra.mxu0 %vm407_vm1, %v2327_v12  ;;  %2038 = vmatmul.mubr.msk.bf16.vlgmr.msra.gmra.mxu1 %vm407_vm1, %v2327_v12 }
  0x98   : > { %2042 = vmatpush3.bf16.msra.mxu0 %v2202_v15  ;;  %2050 = vmatpush3.bf16.msra.mxu1 %v2203_v16  ;;  %v1871_v16 = vld [vmem:[%s2617_s2 + $0x2] ss:$0 sm:$0xff] }
  0x99   : > { %2043 = vmatprep.subr.bf16.mxu0 %v2250_v0  ;;  %2051 = vmatprep.subr.bf16.mxu1 %v2250_v0 }
  0x9a   : > { %2045 = vmatprep.mubr.msk.bf16.mxu0 %vm2251_vm0, %v2250_v0  ;;  %2053 = vmatprep.mubr.msk.bf16.mxu1 %vm2251_vm0, %v2250_v0 }
  0x9c   : > { %2044 = vmatpush3.bf16.msra.mxu0 %v2204_v17  ;;  %2052 = vmatpush3.bf16.msra.mxu1 %v2205_v18  ;;  %v1872_v17 = vld [vmem:[%s2617_s2 + $0x3] ss:$0 sm:$0xff] }
  0x9d   : > { %2057 = vmatprep.subr.bf16.mxu0 %v2250_v0  ;;  %2065 = vmatprep.subr.bf16.mxu1 %v2250_v0 }
  0x9f   : > { %2046 = vmatmul.mubr.msk.bf16.vlgmr.msra.gmra.mxu0 %vm407_vm1, %v2327_v12  ;;  %2054 = vmatmul.mubr.msk.bf16.vlgmr.msra.gmra.mxu1 %vm407_vm1, %v2327_v12 }
  0xa0   : > { %2058 = vmatpush3.bf16.msra.mxu0 %v2206_v19  ;;  %2066 = vmatpush3.bf16.msra.mxu1 %v2207_v20 }
  0xa1   : > { %2059 = vmatprep.subr.bf16.mxu0 %v2250_v0  ;;  %2067 = vmatprep.subr.bf16.mxu1 %v2250_v0 }
  0xa2   : > { %2061 = vmatprep.mubr.msk.bf16.mxu0 %vm2251_vm0, %v2250_v0  ;;  %2069 = vmatprep.mubr.msk.bf16.mxu1 %vm2251_vm0, %v2250_v0 }
  0xa4   : > { %2060 = vmatpush3.bf16.msra.mxu0 %v2208_v21  ;;  %2068 = vmatpush3.bf16.msra.mxu1 %v2209_v22 }
  0xa5   : > { %2073 = vmatprep.subr.bf16.mxu0 %v2250_v0  ;;  %2081 = vmatprep.subr.bf16.mxu1 %v2250_v0 }
  0xa7   : > { %2062 = vmatmul.mubr.msk.bf16.vlgmr.msra.gmra.mxu0 %vm407_vm1, %v2327_v12  ;;  %2070 = vmatmul.mubr.msk.bf16.vlgmr.msra.gmra.mxu1 %vm407_vm1, %v2327_v12 }
  0xa8   : > { %2074 = vmatpush3.bf16.msra.mxu0 %v2210_v23  ;;  %2082 = vmatpush3.bf16.msra.mxu1 %v2211_v24  ;;  %v1877_v24 = vld [vmem:[%s2617_s2 + $0x8] ss:$0 sm:$0xff] }
  0xa9   : > { %2075 = vmatprep.subr.bf16.mxu0 %v2250_v0  ;;  %2083 = vmatprep.subr.bf16.mxu1 %v2250_v0 }
  0xaa   : > { %2077 = vmatprep.mubr.msk.bf16.mxu0 %vm2251_vm0, %v2250_v0  ;;  %2085 = vmatprep.mubr.msk.bf16.mxu1 %vm2251_vm0, %v2250_v0 }
  0xac   : > { %2076 = vmatpush3.bf16.msra.mxu0 %v2212_v25  ;;  %2084 = vmatpush3.bf16.msra.mxu1 %v2213_v26  ;;  %v1878_v25 = vld [vmem:[%s2617_s2 + $0x9] ss:$0 sm:$0xff] }
  0xad   : > { %2089 = vmatprep.subr.bf16.mxu0 %v2250_v0  ;;  %2097 = vmatprep.subr.bf16.mxu1 %v2250_v0 }
  0xaf   : > { %2078 = vmatmul.mubr.msk.bf16.vlgmr.msra.gmra.mxu0 %vm407_vm1, %v2327_v12  ;;  %2086 = vmatmul.mubr.msk.bf16.vlgmr.msra.gmra.mxu1 %vm407_vm1, %v2327_v12 }
  0xb0   : > { %2090 = vmatpush3.bf16.msra.mxu0 %v2214_v27  ;;  %2098 = vmatpush3.bf16.msra.mxu1 %v2215_v28 }
  0xb1   : > { %2091 = vmatprep.subr.bf16.mxu0 %v2250_v0  ;;  %2099 = vmatprep.subr.bf16.mxu1 %v2250_v0 }
  0xb2   : > { %2093 = vmatprep.mubr.msk.bf16.mxu0 %vm2251_vm0, %v2250_v0  ;;  %2101 = vmatprep.mubr.msk.bf16.mxu1 %vm2251_vm0, %v2250_v0 }
  0xb4   : > { %2092 = vmatpush3.bf16.msra.mxu0 %v2216_v29  ;;  %2100 = vmatpush3.bf16.msra.mxu1 %v2217_v30 }
  0xb5   : > { %2105 = vmatprep.subr.bf16.mxu0 %v2250_v0  ;;  %2111 = vmatprep.subr.bf16.mxu1 %v2250_v0 }
  0xb7   : > { %2094 = vmatmul.mubr.msk.bf16.vlgmr.msra.gmra.mxu0 %vm407_vm1, %v2327_v12  ;;  %2102 = vmatmul.mubr.msk.bf16.vlgmr.msra.gmra.mxu1 %vm407_vm1, %v2327_v12 }
  0xb8   : > { %2107 = vmatprep.mubr.msk.bf16.mxu0 %vm2251_vm0, %v2250_v0  ;;  %2113 = vmatprep.mubr.msk.bf16.mxu1 %vm2251_vm0, %v2250_v0 }
 0x14f   : > { %v445_v31 = vpop.f32.mrf.mxu0  ;;  %v497_v32 = vpop.f32.mrf.mxu1 }
 0x150   : > { %v446_v4 = vadd.f32 %v1869_v57, %v445_v31  ;;  %v498_v5 = vadd.f32 %v1870_v58, %v497_v32 }
 0x151   : > { %v2015_v33 = vpop.f32.mrf.mxu0  ;;  %v2023_v34 = vpop.f32.mrf.mxu1 }
 0x152   : > { %v1023_v12 = vpack.c.bf16 %v446_v4, %v446_v4  ;;  %v1024_v13 = vpack.c.bf16 %v498_v5, %v498_v5 }
 0x153   : > { %v448_v35 = vpop.f32.mrf.mxu0  ;;  %v500_v36 = vpop.f32.mrf.mxu1 }
 0x155   : > { %v2016_v37 = vpop.f32.mrf.mxu0  ;;  %v2024_v38 = vpop.f32.mrf.mxu1 }
 0x157   : > { %v549_v39 = vpop.f32.mrf.mxu0  ;;  %v601_v40 = vpop.f32.mrf.mxu1 }
 0x158   : > { %v550_v26 = vadd.f32 %v1871_v16, %v549_v39  ;;  %v602_v27 = vadd.f32 %v1872_v17, %v601_v40 }
 0x159   : > { %v2031_v41 = vpop.f32.mrf.mxu0  ;;  %v2039_v42 = vpop.f32.mrf.mxu1 }
 0x15a   : > { %v1025_v34 = vpack.c.bf16 %v550_v26, %v550_v26  ;;  %v1026_v35 = vpack.c.bf16 %v602_v27, %v602_v27 }
 0x15b   : > { %v552_v43 = vpop.f32.mrf.mxu0  ;;  %v604_v44 = vpop.f32.mrf.mxu1 }
 0x15c   : > { %v1879_v44 = vld [vmem:[%s2617_s2 + $0xa] ss:$0 sm:$0xff] }
 0x15d   : > { %v2032_v45 = vpop.f32.mrf.mxu0  ;;  %v2040_v46 = vpop.f32.mrf.mxu1 }
 0x15e   : > { %v1880_v45 = vld [vmem:[%s2617_s2 + $0xb] ss:$0 sm:$0xff] }
 0x15f   : > { %v653_v49 = vpop.f32.mrf.mxu0  ;;  %v705_v50 = vpop.f32.mrf.mxu1 }
 0x160   : > { %v654_v51 = vadd.f32 %v1873_v47, %v653_v49  ;;  %v706_v52 = vadd.f32 %v1874_v48, %v705_v50 }
 0x161   : > { %v2047_v53 = vpop.f32.mrf.mxu0  ;;  %v2055_v54 = vpop.f32.mrf.mxu1 }
 0x162   : > { %v1027_v55 = vpack.c.bf16 %v654_v51, %v654_v51  ;;  %v1028_v56 = vpack.c.bf16 %v706_v52, %v706_v52 }
 0x163   : > { %v656_v59 = vpop.f32.mrf.mxu0  ;;  %v708_v60 = vpop.f32.mrf.mxu1 }
 0x164   : > { %v1040_v61 = vsel %vm1035_vm2, %v1027_v55, 0  ;;  %v1086_v62 = vsel %vm1035_vm2, %v1028_v56, 0 }
 0x165   : > { %v2048_v63 = vpop.f32.mrf.mxu0  ;;  %v2056_v1 = vpop.f32.mrf.mxu1  ;;  %2106 = vmatpush3.bf16.xpose.msra.mxu0 %v1040_v61  ;;  %2112 = vmatpush3.bf16.xpose.msra.mxu1 %v1086_v62 }
 0x166   : > { %2117 = vmatprep.subr.bf16.mxu0 %v2250_v0  ;;  %2123 = vmatprep.subr.bf16.mxu1 %v2250_v0 }
 0x167   : > { %v757_v6 = vpop.f32.mrf.mxu0  ;;  %v809_v7 = vpop.f32.mrf.mxu1 }
 0x168   : > { %v758_v8 = vadd.f32 %v1875_v2, %v757_v6  ;;  %v810_v9 = vadd.f32 %v1876_v3, %v809_v7 }
 0x169   : > { %v2063_v10 = vpop.f32.mrf.mxu0  ;;  %v2071_v11 = vpop.f32.mrf.mxu1 }
 0x16a   : > { %v1029_v14 = vpack.c.bf16 %v758_v8, %v758_v8  ;;  %v1030_v15 = vpack.c.bf16 %v810_v9, %v810_v9 }
 0x16b   : > { %v760_v18 = vpop.f32.mrf.mxu0  ;;  %v812_v19 = vpop.f32.mrf.mxu1 }
 0x16c   : > { %v1132_v20 = vsel %vm1035_vm2, %v1029_v14, 0  ;;  %v1178_v21 = vsel %vm1035_vm2, %v1030_v15, 0  ;;  %2108 = vmatmul.mubr.msk.bf16.vlgmr.msra.gmra.mxu0 %vm1035_vm2, %v1023_v12  ;;  %2114 = vmatmul.mubr.msk.bf16.vlgmr.msra.gmra.mxu1 %vm1035_vm2, %v1024_v13 }
 0x16d   : > { %v2064_v22 = vpop.f32.mrf.mxu0  ;;  %v2072_v23 = vpop.f32.mrf.mxu1  ;;  %2118 = vmatpush3.bf16.xpose.msra.mxu0 %v1132_v20  ;;  %2124 = vmatpush3.bf16.xpose.msra.mxu1 %v1178_v21 }
 0x16e   : > { %2119 = vmatprep.mubr.msk.bf16.mxu0 %vm2251_vm0, %v2250_v0  ;;  %2125 = vmatprep.mubr.msk.bf16.mxu1 %vm2251_vm0, %v2250_v0 }
 0x16f   : > { %v861_v28 = vpop.f32.mrf.mxu0  ;;  %v913_v29 = vpop.f32.mrf.mxu1  ;;  %2129 = vmatprep.subr.bf16.mxu0 %v2250_v0  ;;  %2135 = vmatprep.subr.bf16.mxu1 %v2250_v0 }
 0x170   : > { %v862_v30 = vadd.f32 %v1877_v24, %v861_v28  ;;  %v914_v31 = vadd.f32 %v1878_v25, %v913_v29 }
 0x171   : > { %v2079_v32 = vpop.f32.mrf.mxu0  ;;  %v2087_v33 = vpop.f32.mrf.mxu1 }
 0x172   : > { %v1031_v36 = vpack.c.bf16 %v862_v30, %v862_v30  ;;  %v1032_v37 = vpack.c.bf16 %v914_v31, %v914_v31 }
 0x173   : > { %v864_v38 = vpop.f32.mrf.mxu0  ;;  %v916_v39 = vpop.f32.mrf.mxu1 }
 0x174   : > { %v1273_v40 = vsel %vm1271_vm3, %v1031_v36, 0  ;;  %v1319_v41 = vsel %vm1271_vm3, %v1032_v37, 0  ;;  %2120 = vmatmul.mubr.msk.bf16.vlgmr.msra.gmra.mxu0 %vm1035_vm2, %v1025_v34  ;;  %2126 = vmatmul.mubr.msk.bf16.vlgmr.msra.gmra.mxu1 %vm1035_vm2, %v1026_v35 }
 0x175   : > { %v2080_v42 = vpop.f32.mrf.mxu0  ;;  %v2088_v43 = vpop.f32.mrf.mxu1  ;;  %2130 = vmatpush3.bf16.msra.mxu0 %v1273_v40  ;;  %2136 = vmatpush3.bf16.msra.mxu1 %v1319_v41 }
 0x176   : > { %2131 = vmatprep.mubr.msk.bf16.mxu0 %vm2251_vm0, %v2250_v0  ;;  %2141 = vmatprep.subr.bf16.mxu0 %v2250_v0 }
 0x177   : > { %v965_v46 = vpop.f32.mrf.mxu0  ;;  %v1017_v47 = vpop.f32.mrf.mxu1  ;;  %2137 = vmatprep.mubr.msk.bf16.mxu1 %vm2251_vm0, %v2250_v0  ;;  %2147 = vmatprep.subr.bf16.mxu1 %v2250_v0 }
 0x178   : > { %v966_v48 = vadd.f32 %v1879_v44, %v965_v46  ;;  %v1018_v49 = vadd.f32 %v1880_v45, %v1017_v47 }
 0x179   : > { %v2095_v50 = vpop.f32.mrf.mxu0  ;;  %v2103_v51 = vpop.f32.mrf.mxu1 }
 0x17a   : > { %v1033_v52 = vpack.c.bf16 %v966_v48, %v966_v48  ;;  %v1034_v53 = vpack.c.bf16 %v1018_v49, %v1018_v49 }
 0x17b   : > { %v968_v54 = vpop.f32.mrf.mxu0  ;;  %v1020_v55 = vpop.f32.mrf.mxu1 }
 0x17c   : > { %v2512_v56 = vsel %vm1271_vm3, %v1033_v52, 0  ;;  %v2515_v57 = vsel %vm1271_vm3, %v1034_v53, 0  ;;  %v2218_v53 = vld [vmem:[%s2618_s3] sm:$0xff]   ;;  %v2220_v54 = vld [vmem:[%s2618_s3 + $0x10] sm:$0xff]   ;;  %v2252_v55 = vmov 0  }
 0x17d   : > { %v2096_v58 = vpop.f32.mrf.mxu0  ;;  %v2104_v59 = vpop.f32.mrf.mxu1  ;;  %2192 = vset.pattern.permute.xlu1 %v2252_v55  ;;  %2193 = vset.pattern.permute.xlu0 %v2252_v55 }
 0x17e   : > { %v1776_v58 = vld [vmem:[%s2619_s4 + $0x18] sm:$0xff] }
 0x22c   : > { %v1076_v60 = vpop.f32.mrf.mxu0  ;;  %v1122_v61 = vpop.f32.mrf.mxu1 }
 0x22d   : > { %v1220_v62 = vsel %vm1035_vm2, %v1076_v60, -inf  ;;  %v1223_v4 = vsel %vm1035_vm2, %v1122_v61, -inf }
 0x22e   : > { %v2115_v63 = vpop.f32.mrf.mxu1  ;;  %1221 = vmax.xlane.f32.xlu1 %v1220_v62  ;;  %v2109_v1 = vpop.f32.mrf.mxu0 }
 0x230   : > { %v1079_v2 = vpop.f32.mrf.mxu0  ;;  %v1125_v3 = vpop.f32.mrf.mxu1 }
 0x232   : > { %v2116_v5 = vpop.f32.mrf.mxu1  ;;  %1224 = vmax.xlane.f32.xlu1 %v1223_v4  ;;  %v2110_v6 = vpop.f32.mrf.mxu0 }
 0x233   : > { %v2219_v6 = vld [vmem:[%s2618_s3 + $0x8] sm:$0xff]  }
 0x234   : > { %v1168_v7 = vpop.f32.mrf.mxu0  ;;  %v1214_v8 = vpop.f32.mrf.mxu1 }
 0x235   : > { %v1226_v9 = vsel %vm1035_vm2, %v1168_v7, -inf  ;;  %v1229_v14 = vsel %vm1035_vm2, %v1214_v8, -inf }
 0x236   : > { %v2127_v10 = vpop.f32.mrf.mxu1  ;;  %1227 = vmax.xlane.f32.xlu1 %v1226_v9  ;;  %v2121_v11 = vpop.f32.mrf.mxu0  ;;  %v2222_v9 = vld [vmem:[%s2618_s3 + $0x20] sm:$0xff]  }
 0x238   : > { %v1171_v12 = vpop.f32.mrf.mxu0  ;;  %v1217_v13 = vpop.f32.mrf.mxu1 }
 0x23a   : > { %v2128_v15 = vpop.f32.mrf.mxu1  ;;  %1230 = vmax.xlane.f32.xlu1 %v1229_v14  ;;  %v2122_v16 = vpop.f32.mrf.mxu0  ;;  %v2221_v14 = vld [vmem:[%s2618_s3 + $0x18] sm:$0xff]  }
 0x2b7   : > { %v1222_v17 = vpop.xlane.xlu1 %1221 }
 0x2b8   : > { %v1232_v18 = vsub.f32 %v1076_v60, %v1222_v17  ;;  %v2224_v17 = vld [vmem:[%s2618_s3 + $0x30] sm:$0xff]  }
 0x2ba   : > { %v1236_v19 = vmul.f32 1.442695, %v1232_v18 }
 0x2bb   : > { %v1225_v20 = vpop.xlane.xlu1 %1224 }
 0x2bc   : > { %2226 = vpow2.f32 %v1236_v19  ;;  %v1233_v21 = vsub.f32 %v1122_v61, %v1225_v20 }
 0x2be   : > { %v1238_v22 = vmul.f32 1.442695, %v1233_v21 }
 0x2bf   : > { %v1228_v23 = vpop.xlane.xlu1 %1227 }
 0x2c0   : > { %2228 = vpow2.f32 %v1238_v22  ;;  %v1234_v24 = vsub.f32 %v1168_v7, %v1228_v23  ;;  %v2223_v22 = vld [vmem:[%s2618_s3 + $0x28] sm:$0xff]  }
 0x2c2   : > { %v1240_v25 = vmul.f32 1.442695, %v1234_v24 }
 0x2c3   : > { %v1231_v26 = vpop.xlane.xlu1 %1230 }
 0x2c4   : > { %2230 = vpow2.f32 %v1240_v25  ;;  %v1235_v27 = vsub.f32 %v1214_v8, %v1231_v26  ;;  %v2225_v25 = vld [vmem:[%s2618_s3 + $0x38] sm:$0xff]  }
 0x2c6   : > { %v1242_v28 = vmul.f32 1.442695, %v1235_v27 }
 0x2c8   : > { %2232 = vpow2.f32 %v1242_v28 }
 0x2c9   : > { %v2227_v29 = vpop.eup %2226 }
 0x2ca   : > { %v1244_v30 = vsel %vm1035_vm2, %v2227_v29, 0.0 }
 0x2cb   : > { %1245 = vadd.xlane.f32.xlu0 %v1244_v30 }
 0x2cd   : > { %v2229_v31 = vpop.eup %2228 }
 0x2ce   : > { %v1247_v32 = vsel %vm1035_vm2, %v2229_v31, 0.0 }
 0x2cf   : > { %1248 = vadd.xlane.f32.xlu1 %v1247_v32 }
 0x2d1   : > { %v2231_v33 = vpop.eup %2230 }
 0x2d2   : > { %v1250_v34 = vsel %vm1035_vm2, %v2231_v33, 0.0 }
 0x2d3   : > { %1251 = vadd.xlane.f32.xlu1 %v1250_v34 }
 0x2d5   : > { %v2233_v35 = vpop.eup %2232 }
 0x2d6   : > { %v1253_v36 = vsel %vm1035_vm2, %v2233_v35, 0.0 }
 0x2d7   : > { %1254 = vadd.xlane.f32.xlu1 %v1253_v36 }
 0x354   : > { %v1246_v37 = vpop.xlane.xlu0 %1245 }
 0x355   : > { %2234 = vrcp.f32 %v1246_v37 }
 0x358   : > { %v1249_v38 = vpop.xlane.xlu1 %1248 }
 0x359   : > { %2236 = vrcp.f32 %v1249_v38 }
 0x35c   : > { %v1252_v39 = vpop.xlane.xlu1 %1251 }
 0x35d   : > { %2238 = vrcp.f32 %v1252_v39 }
 0x360   : > { %v1255_v40 = vpop.xlane.xlu1 %1254 }
 0x361   : > { %2240 = vrcp.f32 %v1255_v40 }
 0x362   : > { %v2235_v41 = vpop.eup %2234 }
 0x363   : > { %v1260_v42 = vmul.f32 %v2235_v41, %v2227_v29 }
 0x365   : > { %v1264_v43 = vpack.c.bf16 %v1260_v42, %v1260_v42 }
 0x366   : > { %v2237_v44 = vpop.eup %2236 }
 0x367   : > { %2132 = vmatmul.mubr.msk.bf16.vlgmr.msra.gmra.mxu0 %vm1035_vm2, %v1264_v43  ;;  %v1261_v45 = vmul.f32 %v2237_v44, %v2229_v31 }
 0x368   : > { %2142 = vmatpush3.bf16.msra.mxu0 %v2512_v56  ;;  %2143 = vmatprep.mubr.msk.bf16.mxu0 %vm2251_vm0, %v2250_v0  ;;  %v1774_v56 = vld [vmem:[%s2619_s4 + $0x8] sm:$0xff] }
 0x369   : > { %v1265_v46 = vpack.c.bf16 %v1261_v45, %v1261_v45 }
 0x36a   : > { %v2239_v47 = vpop.eup %2238 }
 0x36b   : > { %2138 = vmatmul.mubr.msk.bf16.vlgmr.msra.gmra.mxu1 %vm1035_vm2, %v1265_v46  ;;  %v1262_v48 = vmul.f32 %v2239_v47, %v2231_v33 }
 0x36c   : > { %2148 = vmatpush3.bf16.msra.mxu1 %v2515_v57  ;;  %2149 = vmatprep.mubr.msk.bf16.mxu1 %vm2251_vm0, %v2250_v0  ;;  %v1773_v0 = vld [vmem:[%s2619_s4] sm:$0xff]  ;;  %v1775_v57 = vld [vmem:[%s2619_s4 + $0x10] sm:$0xff] }
 0x36d   : > { %v1266_v49 = vpack.c.bf16 %v1262_v48, %v1262_v48  ;;  %1779 = vperm.xlu1 %2192, %v1773_v0  }
 0x36e   : > { %v2241_v50 = vpop.eup %2240 }
 0x36f   : > { %2144 = vmatmul.mubr.msk.bf16.vlgmr.msra.gmra.mxu0 %vm1035_vm2, %v1266_v49  ;;  %v1263_v51 = vmul.f32 %v2241_v50, %v2233_v35 }
 0x370   : > { %2155 = vmatprep.mubr.msk.bf16.mxu0 %vm1035_vm2, %v2218_v53 }
 0x371   : > { %v1267_v52 = vpack.c.bf16 %v1263_v51, %v1263_v51  ;;  %1784 = vperm.xlu1 %2192, %v1774_v56  }
 0x373   : > { %2150 = vmatmul.mubr.msk.bf16.vlgmr.msra.gmra.mxu1 %vm1035_vm2, %v1267_v52 }
 0x374   : > { %2161 = vmatprep.mubr.msk.bf16.mxu1 %vm1035_vm2, %v2220_v54 }
 0x375   : > { %1789 = vperm.xlu1 %2192, %v1775_v57  }
 0x379   : > { %1794 = vperm.xlu1 %2192, %v1776_v58  }
 0x3e8   : > { %v1780_v27 = vpop.permute.xlu1 %1779 }
 0x3ec   : > { %v1785_v33 = vpop.permute.xlu1 %1784 }
 0x3f0   : > { %v1790_v51 = vpop.permute.xlu1 %1789 }
 0x427   : > { %v1309_v59 = vpop.f32.mrf.mxu0 }
 0x428   : > { %v1469_v60 = vpack.c.bf16 %v1309_v59, %v1309_v59 }
 0x429   : > { %v2133_v61 = vpop.f32.mrf.mxu0 }
 0x42a   : > { %v1490_v62 = vsel %vm1035_vm2, %v1469_v60, 0  ;;  %2177 = vmatprep.subr.msk.bf16.mxu0 %vm1035_vm2, %v1469_v60 }
 0x42b   : > { %v1312_v63 = vpop.f32.mrf.mxu0  ;;  %v1355_v1 = vpop.f32.mrf.mxu1  ;;  %2154 = vmatpush3.bf16.xpose.msra.mxu0 %v1490_v62 }
 0x42c   : > { %v1470_v2 = vpack.c.bf16 %v1355_v1, %v1355_v1 }
 0x42d   : > { %v2134_v3 = vpop.f32.mrf.mxu0  ;;  %v2139_v4 = vpop.f32.mrf.mxu1 }
 0x42e   : > { %v1558_v5 = vsel %vm1035_vm2, %v1470_v2, 0  ;;  %2178 = vmatprep.subr.msk.bf16.mxu1 %vm1035_vm2, %v1470_v2 }
 0x42f   : > { %v1358_v7 = vpop.f32.mrf.mxu1  ;;  %v1401_v8 = vpop.f32.mrf.mxu0  ;;  %2160 = vmatpush3.bf16.xpose.msra.mxu1 %v1558_v5 }
 0x430   : > { %v1471_v10 = vpack.c.bf16 %v1401_v8, %v1401_v8 }
 0x431   : > { %v2140_v11 = vpop.f32.mrf.mxu1  ;;  %v2145_v12 = vpop.f32.mrf.mxu0 }
 0x432   : > { %v1626_v13 = vsel %vm1035_vm2, %v1471_v10, 0  ;;  %2156 = vmatmul.mubr.msk.bf16.vlgmr.msra.gmra.mxu0 %vm1035_vm2, %v2219_v6  ;;  %2179 = vmatprep.subr.msk.bf16.mxu0 %vm1035_vm2, %v1471_v10 }
 0x433   : > { %v1404_v15 = vpop.f32.mrf.mxu0  ;;  %v1447_v16 = vpop.f32.mrf.mxu1  ;;  %2166 = vmatpush3.bf16.xpose.msra.mxu0 %v1626_v13  ;;  %2167 = vmatprep.mubr.msk.bf16.mxu0 %vm1035_vm2, %v2222_v9 }
 0x434   : > { %v1472_v18 = vpack.c.bf16 %v1447_v16, %v1447_v16  ;;  %v1795_v9 = vpop.permute.xlu1 %1794 }
 0x435   : > { %v2146_v19 = vpop.f32.mrf.mxu0  ;;  %v2151_v20 = vpop.f32.mrf.mxu1 }
 0x436   : > { %v1694_v21 = vsel %vm1035_vm2, %v1472_v18, 0  ;;  %2162 = vmatmul.mubr.msk.bf16.vlgmr.msra.gmra.mxu1 %vm1035_vm2, %v2221_v14  ;;  %2180 = vmatprep.subr.msk.bf16.mxu1 %vm1035_vm2, %v1472_v18 }
 0x437   : > { %v1450_v23 = vpop.f32.mrf.mxu1  ;;  %2172 = vmatpush3.bf16.xpose.msra.mxu1 %v1694_v21  ;;  %2173 = vmatprep.mubr.msk.bf16.mxu1 %vm1035_vm2, %v2224_v17 }
 0x439   : > { %v2152_v24 = vpop.f32.mrf.mxu1 }
 0x43a   : > { %2168 = vmatmul.mubr.msk.bf16.vlgmr.msra.gmra.mxu0 %vm1035_vm2, %v2223_v22 }
 0x43e   : > { %2174 = vmatmul.mubr.msk.bf16.vlgmr.msra.gmra.mxu1 %vm1035_vm2, %v2225_v25 }
 0x4f2   : > { %v2157_v26 = vpop.f32.mrf.mxu0 }
 0x4f3   : > { %v1759_v37 = vsel %vm1035_vm2, %v2157_v26, 0.0 }
 0x4f4   : > { %v1526_v28 = vpop.f32.mrf.mxu0 }
 0x4f5   : > { %v1745_v43 = vsel %vm1035_vm2, %v1526_v28, 0.0 }
 0x4f6   : > { %v2158_v29 = vpop.f32.mrf.mxu0  ;;  %v2163_v30 = vpop.f32.mrf.mxu1 }
 0x4f7   : > { %v1760_v34 = vsel %vm1035_vm2, %v2163_v30, 0.0  ;;  %v1766_v50 = vsel %vm1035_vm2, %v2158_v29, 0.0 }
 0x4f8   : > { %v1594_v31 = vpop.f32.mrf.mxu1  ;;  %v1529_v32 = vpop.f32.mrf.mxu0  ;;  %v1761_v40 = vadd.f32 %v1760_v34, %v1759_v37 }
 0x4f9   : > { %v1746_v38 = vsel %vm1035_vm2, %v1594_v31, 0.0  ;;  %v1752_v59 = vsel %vm1035_vm2, %v1529_v32, 0.0 }
 0x4fa   : > { %v2164_v35 = vpop.f32.mrf.mxu1  ;;  %v2169_v36 = vpop.f32.mrf.mxu0  ;;  %v1747_v46 = vadd.f32 %v1746_v38, %v1745_v43 }
 0x4fb   : > { %v1762_v39 = vsel %vm1035_vm2, %v2169_v36, 0.0  ;;  %v1767_v44 = vsel %vm1035_vm2, %v2164_v35, 0.0 }
 0x4fc   : > { %v1597_v41 = vpop.f32.mrf.mxu1  ;;  %v1662_v42 = vpop.f32.mrf.mxu0  ;;  %v1763_v47 = vadd.f32 %v1762_v39, %v1761_v40  ;;  %v1768_v0 = vadd.f32 %v1767_v44, %v1766_v50 }
 0x4fd   : > { %v1748_v45 = vsel %vm1035_vm2, %v1662_v42, 0.0  ;;  %v1753_v52 = vsel %vm1035_vm2, %v1597_v41, 0.0 }
 0x4fe   : > { %v2170_v48 = vpop.f32.mrf.mxu0  ;;  %v2175_v49 = vpop.f32.mrf.mxu1  ;;  %v1749_v55 = vadd.f32 %v1748_v45, %v1747_v46  ;;  %v1754_v62 = vadd.f32 %v1753_v52, %v1752_v59 }
 0x4ff   : > { %v1769_v53 = vsel %vm1035_vm2, %v2170_v48, 0.0  ;;  %v1764_v54 = vsel %vm1035_vm2, %v2175_v49, 0.0 }
 0x500   : > { %v1765_v56 = vadd.f32 %v1764_v54, %v1763_v47  ;;  %v1665_v57 = vpop.f32.mrf.mxu0  ;;  %v1730_v58 = vpop.f32.mrf.mxu1  ;;  %v1770_v63 = vadd.f32 %v1769_v53, %v1768_v0 }
 0x501   : > { %v1755_v60 = vsel %vm1035_vm2, %v1665_v57, 0.0  ;;  %v1750_v61 = vsel %vm1035_vm2, %v1730_v58, 0.0 }
 0x502   : > { %v1799_v1 = vadd.f32 %v1790_v51, %v1765_v56  ;;  %v1751_v2 = vadd.f32 %v1750_v61, %v1749_v55  ;;  %v2176_v3 = vpop.f32.mrf.mxu1  ;;  %v1756_v5 = vadd.f32 %v1755_v60, %v1754_v62 }
 0x503   : > { %v1771_v4 = vsel %vm1035_vm2, %v2176_v3, 0.0 }
 0x504   : > { %1803 = vst.msk [vmem:[%s224_s9 + $0x10] sm:$0xff] %vm1035_vm2, %v1799_v1  ;;  %v1797_v6 = vadd.f32 %v1780_v27, %v1751_v2  ;;  %v1772_v7 = vadd.f32 %v1771_v4, %v1770_v63  ;;  %v1733_v8 = vpop.f32.mrf.mxu1 }
 0x505   : > { %v1757_v10 = vsel %vm1035_vm2, %v1733_v8, 0.0 }
 0x506   : > { %1801 = vst.msk [vmem:[%s224_s9] sm:$0xff] %vm1035_vm2, %v1797_v6  ;;  %v1800_v11 = vadd.f32 %v1795_v9, %v1772_v7  ;;  %v1758_v12 = vadd.f32 %v1757_v10, %v1756_v5 }
 0x508   : > { %1804 = vst.msk [vmem:[%s224_s9 + $0x18] sm:$0xff] %vm1035_vm2, %v1800_v11  ;;  %v1798_v13 = vadd.f32 %v1785_v33, %v1758_v12 }
 0x50a   : > { %1802 = vst.msk [vmem:[%s224_s9 + $0x8] sm:$0xff] %vm1035_vm2, %v1798_v13 }
 0x50b PF: > { %s15_s18 = sadd.s32 1, %s2248_s18  }
 0x50c   : > { %p12_p4 = scmp.ge.s32.totalorder %s15_s18, 4  }
 0x50e   :  { %14 = sbr.rel (!%p12_p4) target bundleno = 1 (0x1), region = 70 }

</bundles_post_ra>
